<compile_context>
chip_gen: v6e
topology: v6e:2x2x1
jax: 0.10.0
libtpu: 0.0.40
codegen_flags: <defaults>
</compile_context>

<pallas_src>
import jax
import jax.numpy as jnp
from jax.experimental import pallas as pl
from jax.experimental.pallas import tpu as pltpu


def _round_up(n, m):
    return int(pl.cdiv(n, m)) * m


def mlp_kernel(xt_ref, w1_ref, b1_ref, w2_ref, b2_ref, w3_ref, b3_ref, o_ref):
    # xt_ref: (D, TB) bf16   w*: PyTorch [out, in] bf16   b*: (out, 1) f32
    xt = xt_ref[...]
    # Layer 1: (64, D) @ (D, TB) -> (64, TB), f32 accumulation on the MXU.
    h1 = jnp.dot(w1_ref[...], xt, preferred_element_type=jnp.float32) + b1_ref[...]
    h1 = jnp.maximum(h1, 0.0).astype(jnp.bfloat16)
    # Layer 2: (32, 64) @ (64, TB) -> (32, TB)
    h2 = jnp.dot(w2_ref[...], h1, preferred_element_type=jnp.float32) + b2_ref[...]
    h2 = jnp.maximum(h2, 0.0).astype(jnp.bfloat16)
    # Layer 3: (1, 32) @ (32, TB) -> (1, TB)  -- lane-dense output row.
    out = jnp.dot(w3_ref[...], h2, preferred_element_type=jnp.float32) + b3_ref[...]
    o_ref[...] = out.astype(o_ref.dtype)


def stock_predictor_forward(x, params, *, tile_b=1024):
    """x: [B, input_dim] float32, params in PyTorch layout (w: [out,in], b: [out]).
    Returns [B, 1] float32."""
    w1, b1, w2, b2, w3, b3 = params
    B, D = x.shape

    # Batch tile: 128-aligned (lane-dense output blocks), capped at tile_b rows.
    TB = min(int(tile_b), _round_up(B, 128))
    B_pad = _round_up(B, TB)
    grid = (B_pad // TB,)

    # Wrapper-side layout plumbing: transpose x to feature-major, zero-pad the
    # batch to a multiple of TB, and cast matmul operands to bf16.
    xt = jnp.pad(x.T.astype(jnp.bfloat16), ((0, 0), (0, B_pad - B)))
    w1b, w2b, w3b = (w.astype(jnp.bfloat16) for w in (w1, w2, w3))
    b1c = b1.reshape(-1, 1).astype(jnp.float32)   # (64, 1) broadcast over lanes
    b2c = b2.reshape(-1, 1).astype(jnp.float32)   # (32, 1)
    b3c = b3.reshape(-1, 1).astype(jnp.float32)   # (1, 1)

    flops = 2 * B_pad * (D * 64 + 64 * 32 + 32 * 1)
    bytes_accessed = (
        B_pad * D * 2                                    # x^T stream (bf16)
        + (64 * D + 32 * 64 + 1 * 32) * 2                # resident weights (bf16)
        + (64 + 32 + 1) * 4                              # biases (f32)
        + B_pad * 4                                      # output row (f32)
    )

    out_row = pl.pallas_call(
        mlp_kernel,
        out_shape=jax.ShapeDtypeStruct((1, B_pad), jnp.float32),
        grid=grid,
        in_specs=[
            pl.BlockSpec((D, TB), lambda i: (0, i)),       # streamed x^T tiles
            pl.BlockSpec(w1b.shape, lambda i: (0, 0)),     # grid-invariant weights:
            pl.BlockSpec(b1c.shape, lambda i: (0, 0)),     # stay resident in VMEM
            pl.BlockSpec(w2b.shape, lambda i: (0, 0)),
            pl.BlockSpec(b2c.shape, lambda i: (0, 0)),
            pl.BlockSpec(w3b.shape, lambda i: (0, 0)),
            pl.BlockSpec(b3c.shape, lambda i: (0, 0)),
        ],
        out_specs=pl.BlockSpec((1, TB), lambda i: (0, i)),  # lane-dense output
        compiler_params=pltpu.CompilerParams(
            dimension_semantics=("parallel",),
        ),
        cost_estimate=pl.CostEstimate(
            flops=flops, transcendentals=0, bytes_accessed=bytes_accessed
        ),
    )(xt, w1b, b1c, w2b, b2c, w3b, b3c)

    # Undo layout plumbing: drop batch padding, back to the PyTorch [B, 1] shape.
    return out_row[0, :B].reshape(B, 1)


def init_params(key, input_dim):
    """PyTorch nn.Linear default init: U[-1/sqrt(fan_in), 1/sqrt(fan_in)],
    weights in PyTorch [out, in] layout, biases [out]."""
    dims = [(input_dim, 64), (64, 32), (32, 1)]
    params = []
    for fan_in, fan_out in dims:
        kw, kb, key = jax.random.split(key, 3)
        bound = 1.0 / jnp.sqrt(float(fan_in))
        w = jax.random.uniform(kw, (fan_out, fan_in), jnp.float32, -bound, bound)
        b = jax.random.uniform(kb, (fan_out,), jnp.float32, -bound, bound)
        params += [w, b]
    return tuple(params)


def reference_forward(x, params, *, match_kernel_dtype=True):
    """Pure-JAX reference.  match_kernel_dtype=True mirrors the kernel's bf16
    operand casts (f32 accumulation); False is the exact f32 PyTorch math."""
    w1, b1, w2, b2, w3, b3 = params
    cast = (lambda a: a.astype(jnp.bfloat16)) if match_kernel_dtype else (lambda a: a)
    h = jnp.dot(cast(x), cast(w1).T, preferred_element_type=jnp.float32) + b1
    h = jnp.maximum(h, 0.0)
    h = jnp.dot(cast(h), cast(w2).T, preferred_element_type=jnp.float32) + b2
    h = jnp.maximum(h, 0.0)
    return jnp.dot(cast(h), cast(w3).T, preferred_element_type=jnp.float32) + b3


if __name__ == "__main__":
    key = jax.random.PRNGKey(0)
    kx, kp = jax.random.split(key)

    batch, input_dim = 8, 16
    x = jax.random.normal(kx, (batch, input_dim), dtype=jnp.float32)
    params = init_params(kp, input_dim)

    out = stock_predictor_forward(x, params)
    out = jax.block_until_ready(out)
    assert out.shape == (batch, 1)

    # Tight check against a reference with the same bf16 operand casts.
    ref_bf16 = reference_forward(x, params, match_kernel_dtype=True)
    assert jnp.allclose(out, ref_bf16, atol=1e-3, rtol=1e-3)

    # Loose sanity check against the exact f32 PyTorch math.
    ref_f32 = reference_forward(x, params, match_kernel_dtype=False)
    assert jnp.allclose(out, ref_f32, atol=6e-2, rtol=6e-2)

    print("KERNEL_OK")
</pallas_src>

<mosaic_0001>
module attributes {stable_mosaic.version = 11 : i64} {
  func.func @mlp_kernel(%arg0: i32, %arg1: memref<16x128xbf16, #tpu.memory_space<vmem>>, %arg2: memref<64x16xbf16, #tpu.memory_space<vmem>>, %arg3: memref<64x1xf32, #tpu.memory_space<vmem>>, %arg4: memref<32x64xbf16, #tpu.memory_space<vmem>>, %arg5: memref<32x1xf32, #tpu.memory_space<vmem>>, %arg6: memref<1x32xbf16, #tpu.memory_space<vmem>>, %arg7: memref<1x1xf32, #tpu.memory_space<vmem>>, %arg8: memref<1x128xf32, #tpu.memory_space<vmem>>) attributes {dimension_semantics = [#tpu.dimension_semantics<parallel>], iteration_bounds = array<i64: 1>, scalar_prefetch = 0 : i64, scratch_operands = 0 : i64, tpu.core_type = #tpu.core_type<tc>, window_params = [{transform_indices = @transform_0, window_bounds = array<i64: 16, 128>}, {pipeline_mode = #tpu.pipeline_mode<synchronous>, transform_indices = @transform_1, window_bounds = array<i64: 64, 16>}, {pipeline_mode = #tpu.pipeline_mode<synchronous>, transform_indices = @transform_2, window_bounds = array<i64: 64, 1>}, {pipeline_mode = #tpu.pipeline_mode<synchronous>, transform_indices = @transform_3, window_bounds = array<i64: 32, 64>}, {pipeline_mode = #tpu.pipeline_mode<synchronous>, transform_indices = @transform_4, window_bounds = array<i64: 32, 1>}, {pipeline_mode = #tpu.pipeline_mode<synchronous>, transform_indices = @transform_5, window_bounds = array<i64: 1, 32>}, {pipeline_mode = #tpu.pipeline_mode<synchronous>, transform_indices = @transform_6, window_bounds = array<i64: 1, 1>}, {transform_indices = @transform_7, window_bounds = array<i64: 1, 128>}]} {
    %c0 = arith.constant 0 : index
    %c0_0 = arith.constant 0 : index
    %0 = vector.load %arg1[%c0, %c0_0] : memref<16x128xbf16, #tpu.memory_space<vmem>>, vector<16x128xbf16>
    %c0_1 = arith.constant 0 : index
    %c0_2 = arith.constant 0 : index
    %1 = vector.load %arg2[%c0_1, %c0_2] : memref<64x16xbf16, #tpu.memory_space<vmem>>, vector<64x16xbf16>
    %cst = arith.constant dense<0.000000e+00> : vector<64x128xf32>
    %2 = tpu.matmul %1, %0, %cst {dimension_numbers = #tpu.dot_dimension_numbers<[1], [0], [0], [1], [0, 0, 1, 1], [], []>} : vector<64x16xbf16>, vector<16x128xbf16>, vector<64x128xf32> -> vector<64x128xf32>
    %c0_3 = arith.constant 0 : index
    %c0_4 = arith.constant 0 : index
    %3 = vector.load %arg3[%c0_3, %c0_4] : memref<64x1xf32, #tpu.memory_space<vmem>>, vector<64x1xf32>
    %4 = vector.broadcast %3 : vector<64x1xf32> to vector<64x128xf32>
    %5 = arith.addf %2, %4 : vector<64x128xf32>
    %cst_5 = arith.constant 0.000000e+00 : f32
    %6 = vector.broadcast %cst_5 : f32 to vector<64x128xf32>
    %7 = arith.maximumf %5, %6 : vector<64x128xf32>
    %8 = arith.truncf %7 : vector<64x128xf32> to vector<64x128xbf16>
    %c0_6 = arith.constant 0 : index
    %c0_7 = arith.constant 0 : index
    %9 = vector.load %arg4[%c0_6, %c0_7] : memref<32x64xbf16, #tpu.memory_space<vmem>>, vector<32x64xbf16>
    %cst_8 = arith.constant dense<0.000000e+00> : vector<32x128xf32>
    %10 = tpu.matmul %9, %8, %cst_8 {dimension_numbers = #tpu.dot_dimension_numbers<[1], [0], [0], [1], [0, 0, 1, 1], [], []>} : vector<32x64xbf16>, vector<64x128xbf16>, vector<32x128xf32> -> vector<32x128xf32>
    %c0_9 = arith.constant 0 : index
    %c0_10 = arith.constant 0 : index
    %11 = vector.load %arg5[%c0_9, %c0_10] : memref<32x1xf32, #tpu.memory_space<vmem>>, vector<32x1xf32>
    %12 = vector.broadcast %11 : vector<32x1xf32> to vector<32x128xf32>
    %13 = arith.addf %10, %12 : vector<32x128xf32>
    %cst_11 = arith.constant 0.000000e+00 : f32
    %14 = vector.broadcast %cst_11 : f32 to vector<32x128xf32>
    %15 = arith.maximumf %13, %14 : vector<32x128xf32>
    %16 = arith.truncf %15 : vector<32x128xf32> to vector<32x128xbf16>
    %c0_12 = arith.constant 0 : index
    %c0_13 = arith.constant 0 : index
    %17 = vector.load %arg6[%c0_12, %c0_13] : memref<1x32xbf16, #tpu.memory_space<vmem>>, vector<1x32xbf16>
    %cst_14 = arith.constant dense<0.000000e+00> : vector<1x128xf32>
    %18 = tpu.matmul %17, %16, %cst_14 {dimension_numbers = #tpu.dot_dimension_numbers<[1], [0], [0], [1], [0, 0, 1, 1], [], []>} : vector<1x32xbf16>, vector<32x128xbf16>, vector<1x128xf32> -> vector<1x128xf32>
    %c0_15 = arith.constant 0 : index
    %c0_16 = arith.constant 0 : index
    %19 = vector.load %arg7[%c0_15, %c0_16] : memref<1x1xf32, #tpu.memory_space<vmem>>, vector<1x1xf32>
    %20 = vector.broadcast %19 : vector<1x1xf32> to vector<1x128xf32>
    %21 = arith.addf %18, %20 : vector<1x128xf32>
    %c0_17 = arith.constant 0 : index
    %c0_18 = arith.constant 0 : index
    %22 = vector.load %arg8[%c0_17, %c0_18] : memref<1x128xf32, #tpu.memory_space<vmem>>, vector<1x128xf32>
    tpu.vector_store %arg8[%c0_17, %c0_18], %21 {strides = array<i32>} : memref<1x128xf32, #tpu.memory_space<vmem>>, vector<1x128xf32>,
    return
  }
  func.func @transform_0(%arg0: i32) -> (i32, i32) {
    %c0_i32 = arith.constant 0 : i32
    %c0_i32_0 = arith.constant 0 : i32
    return %c0_i32, %arg0 : i32, i32
  }
  func.func @transform_1(%arg0: i32) -> (i32, i32) {
    %c0_i32 = arith.constant 0 : i32
    %c0_i32_0 = arith.constant 0 : i32
    %c0_i32_1 = arith.constant 0 : i32
    return %c0_i32, %c0_i32_0 : i32, i32
  }
  func.func @transform_2(%arg0: i32) -> (i32, i32) {
    %c0_i32 = arith.constant 0 : i32
    %c0_i32_0 = arith.constant 0 : i32
    %c0_i32_1 = arith.constant 0 : i32
    return %c0_i32, %c0_i32_0 : i32, i32
  }
  func.func @transform_3(%arg0: i32) -> (i32, i32) {
    %c0_i32 = arith.constant 0 : i32
    %c0_i32_0 = arith.constant 0 : i32
    %c0_i32_1 = arith.constant 0 : i32
    return %c0_i32, %c0_i32_0 : i32, i32
  }
  func.func @transform_4(%arg0: i32) -> (i32, i32) {
    %c0_i32 = arith.constant 0 : i32
    %c0_i32_0 = arith.constant 0 : i32
    %c0_i32_1 = arith.constant 0 : i32
    return %c0_i32, %c0_i32_0 : i32, i32
  }
  func.func @transform_5(%arg0: i32) -> (i32, i32) {
    %c0_i32 = arith.constant 0 : i32
    %c0_i32_0 = arith.constant 0 : i32
    %c0_i32_1 = arith.constant 0 : i32
    return %c0_i32, %c0_i32_0 : i32, i32
  }
  func.func @transform_6(%arg0: i32) -> (i32, i32) {
    %c0_i32 = arith.constant 0 : i32
    %c0_i32_0 = arith.constant 0 : i32
    %c0_i32_1 = arith.constant 0 : i32
    return %c0_i32, %c0_i32_0 : i32, i32
  }
  func.func @transform_7(%arg0: i32) -> (i32, i32) {
    %c0_i32 = arith.constant 0 : i32
    %c0_i32_0 = arith.constant 0 : i32
    return %c0_i32, %arg0 : i32, i32
  }
}

</mosaic_0001>

<bundles_post_ra>
// kernel: tpu_custom_call.1
= control target key start
LH: loop header
LB: loop body
LE: loop exit
PB: predicated region body
PF: predicated region fallthrough
CT: control target
= control target key end

     0   :  { %s583_s0 = inlined_call_operand.vmem [shape: bf16[16,128], index: 0, kind: input, shape index: {}]   ;;  %s584_s1 = inlined_call_operand.vmem [shape: bf16[64,16], index: 1, kind: input, shape index: {}]   ;;  %s585_s2 = inlined_call_operand.vmem [shape: f32[64,1], index: 2, kind: input, shape index: {}]   ;;  %s586_s3 = inlined_call_operand.vmem [shape: bf16[32,64], index: 3, kind: input, shape index: {}]   ;;  %s587_s4 = inlined_call_operand.vmem [shape: f32[32,1], index: 4, kind: input, shape index: {}]   ;;  %s588_s5 = inlined_call_operand.vmem [shape: bf16[1,32], index: 5, kind: input, shape index: {}]   ;;  %s589_s6 = inlined_call_operand.<no memory space> [shape: f32[1,1], index: 6, kind: input, shape index: {}]   ;;  %s590_s7 = inlined_call_operand.hbm [shape: f32[1,128], index: 7, kind: output, shape index: {}]  }
   0x1   :  { %v12_v0 = vstv %s589_s6 }
   0x2   :  { %13 = vst [vmem:[#allocation2] sm:$0x1] %v12_v0 }
   0x3   :  { %v438_v1 = vld [vmem:[%s583_s0] sm:$0xff]   ;;  %vm114_vm0 = vcmask 130048   ;;  %v440_v3 = vld [vmem:[%s584_s1 + $0x8] sm:$0xff]   ;;  %v467_v4 = vmov 0   ;;  %v441_v5 = vld [vmem:[%s584_s1 + $0x10] sm:$0xff]  }
   0x4   :  { %v439_v2 = vld [vmem:[%s584_s1] sm:$0xff]   ;;  %402 = vmatprep.subr.bf16.mxu0 %v438_v1  ;;  %436 = vset.pattern.permute.xlu0 %v467_v4  ;;  %v46_v6 = vld [vmem:[%s585_s2 + $0x30] sm:$0xff]  ;;  %v47_v8 = vld [vmem:[%s585_s2 + $0x38] sm:$0xff] }
   0x5   :  { %403 = vmatpush3.bf16.msra.mxu0 %v438_v1  ;;  %404 = vmatprep.mubr.msk.bf16.mxu0 %vm114_vm0, %v439_v2  ;;  %v44_v7 = vld [vmem:[%s585_s2 + $0x20] sm:$0xff]  ;;  %v45_v9 = vld [vmem:[%s585_s2 + $0x28] sm:$0xff]  ;;  %v442_v10 = vld [vmem:[%s584_s1 + $0x18] sm:$0xff]  }
   0x6   :  { %437 = vset.pattern.permute.xlu1 %v467_v4  ;;  %80 = vperm.xlu0 %436, %v46_v6  }
   0x7   :  { %70 = vperm.xlu1 %437, %v44_v7  }
   0x8   :  { %405 = vmatmul.mubr.msk.bf16.vlgmr.msra.gmra.mxu0 %vm114_vm0, %v440_v3 }
   0x9   :  { %408 = vmatprep.mubr.msk.bf16.mxu0 %vm114_vm0, %v441_v5 }
   0xa   :  { %85 = vperm.xlu0 %436, %v47_v8  }
   0xb   :  { %14 = vsyncpa [#allocation4], 0  ;;  %v42_v11 = vld [vmem:[%s585_s2 + $0x10] sm:$0xff]  ;;  %75 = vperm.xlu1 %437, %v45_v9   ;;  %v43_v12 = vld [vmem:[%s585_s2 + $0x18] sm:$0xff]  ;;  %vm242_vm1 = vcmask 523264   ;;  %v468_v58 = vmov 0.0  }
   0xc   :  { %v40_v13 = vld [vmem:[%s585_s2] sm:$0xff]  ;;  %v41_v14 = vld [vmem:[%s585_s2 + $0x8] sm:$0xff]  ;;  %v210_v15 = vld [vmem:[%s587_s4 + $0x10] sm:$0xff]  ;;  %424 = vmatprep.subr.bf16.mxu0 %v468_v58  ;;  %vm469_vm2 = vmmov 0   ;;  %vm315_vm3 = vcmask 261120   ;;  %s470_s12 = smov [#allocation3]  }
   0xd   :  { %v211_v16 = vld [vmem:[%s587_s4 + $0x18] sm:$0xff]  ;;  %v208_v17 = vld [vmem:[%s587_s4] sm:$0xff]  ;;  %v209_v18 = vld [vmem:[%s587_s4 + $0x8] sm:$0xff]  ;;  %s366_s13 = sshll.u32 %s470_s12, 4  ;;  %s367_s13 = int_to_ptr.vmem [resolvable:$true] %s366_s13 }
   0xe   :  { %60 = vperm.xlu0 %436, %v42_v11   ;;  %v305_v19 = vld [vmem:[#allocation2] sm:$0x1]  ;;  %v444_v57 = vld [vmem:[%s586_s3 + $0x8] sm:$0xff]   ;;  %s445_s14 = scalar_lea.vmem %s367_s13, 16  ;;  %s449_s15 = scalar_lea.vmem %s367_s13, 32 }
   0xf   :  { %65 = vperm.xlu1 %437, %v43_v12   ;;  %v443_v20 = vld [vmem:[%s586_s3] sm:$0xff]   ;;  %p446_p0 = scmp.ne.s32.totalorder %s367_s13, %s445_s14  ;;  %p450_p1 = scmp.lt.s32.totalorder %s367_s13, %s367_s13 }
  0x10   :  { %409 = vmatmul.mubr.msk.bf16.gmra.mxu0 %vm114_vm0, %v442_v10  ;;  %420 = vmatprep.mubr.msk.bf16.mxu1 %vm242_vm1, %v443_v20  ;;  %p451_p2 = scmp.lt.s32.totalorder %s449_s15, %s445_s14 }
  0x11   :  { %428 = vmatprep.mubr.msk.bf16.mxu0 %vm469_vm2, %v468_v58 }
  0x12   :  { %50 = vperm.xlu0 %436, %v40_v13   ;;  %v304_v13 = vld [vmem:[%s588_s5] sm:$0x1]  ;;  %p452_p3 = por %p451_p2, %p450_p1 }
  0x13   :  { %55 = vperm.xlu1 %437, %v41_v14   ;;  %v311_v14 = vlaneseq }
  0x14   :  { %p453_p4 = pnand %p452_p3, %p446_p0 }
  0x16   :  { %224 = vperm.xlu0 %436, %v210_v15   ;;  %v312_v15 = vshrl.u32 %v311_v14, 7 }
  0x17   :  { %229 = vperm.xlu1 %437, %v211_v16  }
  0x18   :  { %v313_v16 = vsub.s32 0, %v312_v15 }
  0x1a   :  { %214 = vperm.xlu0 %436, %v208_v17  }
  0x1b   :  { %219 = vperm.xlu1 %437, %v209_v18  }
  0x1e   :  { %308 = vperm.xlu0 %436, %v305_v19  }
  0x81   :  { %v81_v23 = vpop.permute.xlu0 %80 }
  0x82   :  { %v71_v21 = vpop.permute.xlu1 %70 }
  0x85   :  { %v86_v28 = vpop.permute.xlu0 %85 }
  0x86   :  { %v76_v26 = vpop.permute.xlu1 %75 }
  0x89   :  { %v61_v36 = vpop.permute.xlu0 %60 }
  0x8a   :  { %v66_v32 = vpop.permute.xlu1 %65 }
  0x8d   :  { %v51_v50 = vpop.permute.xlu0 %50 }
  0x8e   :  { %v56_v46 = vpop.permute.xlu1 %55 }
  0x91   :  { %v225_v59 = vpop.permute.xlu0 %224 }
  0x92   :  { %v230_v60 = vpop.permute.xlu1 %229 }
  0x95   :  { %v215_v1 = vpop.permute.xlu0 %214 }
  0x96   :  { %v220_v3 = vpop.permute.xlu1 %219 }
  0x99   :  { %v309_v17 = vpop.permute.xlu0 %308 }
  0x9a   :  { %v314_v18 = vrot.slane %v309_v17, %v313_v16 }
  0xc8   :  { %v406_v22 = vpop.f32.mrf.mxu0 }
  0xc9   :  { %v170_v42 = vadd.f32 %v406_v22, %v61_v36 }
  0xca   :  { %v161_v24 = vpop.f32.mrf.mxu0 }
  0xcb   :  { %v194_v51 = vmax.f32 %v170_v42, 0.0  ;;  %v162_v52 = vadd.f32 %v161_v24, %v51_v50 }
  0xcc   :  { %v407_v25 = vpop.f32.mrf.mxu0 }
  0xcd   :  { %v173_v38 = vadd.f32 %v407_v25, %v66_v32  ;;  %v192_v55 = vmax.f32 %v162_v52, 0.0 }
  0xce   :  { %v164_v27 = vpop.f32.mrf.mxu0 }
  0xcf   :  { %v195_v47 = vmax.f32 %v173_v38, 0.0  ;;  %v165_v48 = vadd.f32 %v164_v27, %v56_v46 }
  0xd0   :  { %v410_v29 = vpop.f32.mrf.mxu0 }
  0xd1   :  { %v186_v31 = vadd.f32 %v410_v29, %v81_v23  ;;  %v201_v53 = vpack.c.bf16 %v195_v47, %v194_v51  ;;  %v193_v54 = vmax.f32 %v165_v48, 0.0 }
  0xd2   :  { %v177_v30 = vpop.f32.mrf.mxu0 }
  0xd3   :  { %v178_v34 = vadd.f32 %v177_v30, %v71_v21  ;;  %v198_v39 = vmax.f32 %v186_v31, 0.0  ;;  %v200_v56 = vpack.c.bf16 %v193_v54, %v192_v55 }
  0xd4   :  { %v411_v33 = vpop.f32.mrf.mxu0 }
  0xd5   :  { %v189_v35 = vadd.f32 %v411_v33, %v86_v28  ;;  %v196_v43 = vmax.f32 %v178_v34, 0.0 }
  0xd6   :  { %v180_v37 = vpop.f32.mrf.mxu0 }
  0xd7   :  { %v199_v40 = vmax.f32 %v189_v35, 0.0  ;;  %v181_v41 = vadd.f32 %v180_v37, %v76_v26 }
  0xd9   :  { %v197_v44 = vmax.f32 %v181_v41, 0.0  ;;  %v203_v45 = vpack.c.bf16 %v199_v40, %v198_v39 }
  0xdb   :  { %v202_v49 = vpack.c.bf16 %v197_v44, %v196_v43  ;;  %412 = vmatprep.subr.bf16.mxu1 %v203_v45 }
  0xdc   :  { %413 = vmatpush3.bf16.msra.mxu1 %v203_v45 }
  0xdd   :  { %414 = vmatprep.subr.bf16.mxu1 %v202_v49 }
  0xe0   :  { %415 = vmatpush3.bf16.msra.mxu1 %v202_v49 }
  0xe1   :  { %416 = vmatprep.subr.bf16.mxu1 %v201_v53 }
  0xe4   :  { %417 = vmatpush3.bf16.msra.mxu1 %v201_v53 }
  0xe5   :  { %418 = vmatprep.subr.bf16.mxu1 %v200_v56 }
  0xe8   :  { %419 = vmatpush3.bf16.msra.mxu1 %v200_v56 }
  0xeb   :  { %421 = vmatmul.mubr.msk.bf16.vlgmr.msra.gmra.mxu1 %vm242_vm1, %v444_v57 }
 0x1ab   :  { %v422_v61 = vpop.f32.mrf.mxu1 }
 0x1ac   :  { %v292_v63 = vadd.f32 %v422_v61, %v225_v59 }
 0x1ad   :  { %v283_v62 = vpop.f32.mrf.mxu1 }
 0x1ae   :  { %v300_v5 = vmax.f32 %v292_v63, 0.0  ;;  %v284_v6 = vadd.f32 %v283_v62, %v215_v1 }
 0x1af   :  { %v423_v0 = vpop.f32.mrf.mxu1 }
 0x1b0   :  { %v295_v2 = vadd.f32 %v423_v0, %v230_v60  ;;  %v298_v11 = vmax.f32 %v284_v6, 0.0 }
 0x1b1   :  { %v286_v4 = vpop.f32.mrf.mxu1 }
 0x1b2   :  { %v301_v7 = vmax.f32 %v295_v2, 0.0  ;;  %v287_v8 = vadd.f32 %v286_v4, %v220_v3 }
 0x1b4   :  { %v303_v9 = vpack.c.bf16 %v301_v7, %v300_v5  ;;  %v299_v10 = vmax.f32 %v287_v8, 0.0 }
 0x1b6   :  { %425 = vmatpush3.bf16.msra.mxu0 %v303_v9  ;;  %v302_v12 = vpack.c.bf16 %v299_v10, %v298_v11 }
 0x1b7   :  { %426 = vmatprep.subr.bf16.mxu0 %v468_v58 }
 0x1ba   :  { %427 = vmatpush3.bf16.msra.mxu0 %v302_v12 }
 0x1bd   :  { %429 = vmatmul.mubr.msk.bf16.vlgmr.msra.gmra.mxu0 %vm315_vm3, %v304_v13 }
 0x27d   :  { %v353_v19 = vpop.f32.mrf.mxu0 }
 0x27e   :  { %v354_v20 = vadd.f32 %v353_v19, %v314_v18 }
 0x27f   :  { %v430_v21 = vpop.f32.mrf.mxu0 }
 0x280   :  { %359 = vst [vmem:[#allocation3] sm:$0x1] %v354_v20 }
 0x281   :  { %v356_v22 = vpop.f32.mrf.mxu0 }
 0x282   :  { %456 = shalt.err (!%p453_p4)
}
 0x283   :  { %369 = dma.vmem_to_hbm [thread:$0]  %s367_s13, 16, %s590_s7, [#allocation4]   ;;  %v431_v23 = vpop.f32.mrf.mxu0 }
 0x284   :  { %465 = dma.done.wait [#allocation4], 16  }
 0x285   :  { %466 = vsyncadd [#allocation4], 4294967280 }
 0x286   :  { %373 = vsyncpa [#allocation4], 1 }

</bundles_post_ra>
